<compile_context>
chip_gen: v7x
topology: tpu7x:2x2x1
jax: 0.10.0
libtpu: 0.0.40
codegen_flags: <defaults>
</compile_context>

<pallas_src>
import functools

import jax
import jax.numpy as jnp
from jax.experimental import pallas as pl
from jax.experimental.pallas import tpu as pltpu


HIDDEN = 64
H2 = 2 * HIDDEN            # 128: fused [actor | critic] width == one lane register
LANE = 128
TB_MAX = 2048              # per review: 512-1024+ rows reach ~85% of HBM roofline


def _round_up(x, m):
    return ((x + m - 1) // m) * m


# ----------------------------------------------------------------------------
# Kernel
# ----------------------------------------------------------------------------
def _ppo_kernel(s_ref, p_ref, probs_ref, value_ref, *, pad_sd, action_dim):
    # s_ref:     (TB, pad_sd)        state tile (zero-padded features / rows)
    # p_ref:     (pad_sd+280, 128)   packed fused params (VMEM-resident)
    # probs_ref: (TB, action_dim)    actor probabilities
    # value_ref: (TB, 1)             critic value
    x = s_ref[...]

    w1 = p_ref[0:pad_sd, :]                        # (pad_sd, 128)  [aw1 | cw1]
    w2 = p_ref[pad_sd:pad_sd + H2, :]              # (128, 128)     blockdiag
    w3 = p_ref[pad_sd + H2:pad_sd + 2 * H2, :]     # (128, 128)     blockdiag
    boff = pad_sd + 2 * H2                         # bias slabs, 8-row aligned
    b1 = p_ref[boff + 0:boff + 1, :]               # (1, 128)
    b2 = p_ref[boff + 8:boff + 9, :]               # (1, 128)
    b3 = p_ref[boff + 16:boff + 17, :]             # (1, 128)

    # Fused [actor | critic] trunk: three N=128 MXU matmuls.
    h = jnp.tanh(jnp.dot(x, w1, preferred_element_type=jnp.float32) + b1)
    h = jnp.tanh(jnp.dot(h, w2, preferred_element_type=jnp.float32) + b2)
    z = jnp.dot(h, w3, preferred_element_type=jnp.float32) + b3   # (TB, 128)
    # z lanes: [0, action_dim) = actor logits, lane action_dim = critic value.

    lane = jax.lax.broadcasted_iota(jnp.int32, z.shape, dimension=1)
    is_logit = lane < action_dim

    # Numerically stable softmax over the actor-logit lanes only.
    masked = jnp.where(is_logit, z, -jnp.inf)
    m = jnp.max(masked, axis=-1, keepdims=True)
    e = jnp.exp(masked - m)                        # 0 in non-logit lanes
    denom = jnp.sum(e, axis=-1, keepdims=True)     # >= 1, so recip is safe
    inv = pl.reciprocal(denom, approx=True)        # EUP slot
    inv = inv * (2.0 - denom * inv)                # one Newton step: ~1e-7 rel err
    probs = e * inv

    probs_ref[...] = probs[:, :action_dim]
    value_ref[...] = z[:, action_dim:action_dim + 1]


# ----------------------------------------------------------------------------
# One-time weight fusion (outside the hot path)
# ----------------------------------------------------------------------------
def pack_params(params, state_dim, action_dim):
    """Fuse actor+critic weights into one lane-dense packed f32 buffer.

    Row layout (all 128 lanes wide):
      [0, pad_sd)               : W1 = [aw1 | cw1], zero-padded rows
      [pad_sd, +128)            : W2 = blockdiag(aw2, cw2)
      [pad_sd+128, +128)        : W3 (aw3 -> lanes [0,A), cw3 -> lane A)
      [pad_sd+256, +8)          : b1 slab (row 0 = b1, rest zeros)  8-aligned
      [pad_sd+264, +8)          : b2 slab                           8-aligned
      [pad_sd+272, +8)          : b3 slab                           8-aligned
    """
    assert action_dim + 1 <= H2, "action_dim + 1 must fit in 128 lanes"
    pad_sd = _round_up(max(state_dim, 1), 8)

    w1 = jnp.concatenate([params["aw1"], params["cw1"]], axis=1)          # (sd,128)
    w1 = jnp.pad(w1, ((0, pad_sd - state_dim), (0, 0)))
    b1 = jnp.concatenate([params["ab1"], params["cb1"]], axis=1)          # (1,128)

    w2 = jnp.zeros((H2, H2), jnp.float32)
    w2 = w2.at[:HIDDEN, :HIDDEN].set(params["aw2"])
    w2 = w2.at[HIDDEN:, HIDDEN:].set(params["cw2"])
    b2 = jnp.concatenate([params["ab2"], params["cb2"]], axis=1)          # (1,128)

    w3 = jnp.zeros((H2, H2), jnp.float32)
    w3 = w3.at[:HIDDEN, :action_dim].set(params["aw3"])
    w3 = w3.at[HIDDEN:, action_dim:action_dim + 1].set(params["cw3"])
    b3 = jnp.zeros((1, H2), jnp.float32)
    b3 = b3.at[:, :action_dim].set(params["ab3"])
    b3 = b3.at[:, action_dim:action_dim + 1].set(params["cb3"])

    def slab(b):  # 8-row-aligned bias slab: row 0 = bias, rows 1..7 = zeros
        return jnp.concatenate([b, jnp.zeros((7, H2), jnp.float32)], axis=0)

    return jnp.concatenate([w1, w2, w3, slab(b1), slab(b2), slab(b3)], axis=0)


# ----------------------------------------------------------------------------
# Tile selection: VMEM-budget-aware, >=2 even grid steps, minimal row padding
# ----------------------------------------------------------------------------
def _pick_tiles(batch, pad_sd):
    lane_sd = _round_up(pad_sd, LANE)   # VMEM lane-pads the state tile to 128
    # f32 bytes per batch row resident in VMEM:
    #   2x double-buffered state tile + 2x double-buffered probs tile
    #   + 2x double-buffered value tile (both lane-pad to 128 in VMEM)
    #   + ~4 live 128-wide f32 temps (h, z, e, probs).
    per_row = 4 * (2 * lane_sd + 2 * LANE + 2 * LANE + 4 * LANE)
    budget = 16 * 1024 * 1024           # tile budget; weights (~150 KiB) on top
    tb_cap = min(TB_MAX, max(8, (budget // per_row) // 8 * 8))

    n_tiles = max(2, pl.cdiv(batch, tb_cap))   # >=2 so both v7x TCs get work
    if n_tiles % 2:
        n_tiles += 1                           # even split balances the 2 cores
    tb = _round_up(pl.cdiv(batch, n_tiles), 8)
    padded_b = tb * n_tiles                    # padding waste < 8 * n_tiles rows
    return tb, n_tiles, padded_b


# ----------------------------------------------------------------------------
# Wrapper
# ----------------------------------------------------------------------------
@functools.partial(jax.jit, static_argnames=("action_dim",))
def ppo_actor_critic_forward(state, packed_params, action_dim):
    """state: (B, state_dim) f32. Returns (probs (B, action_dim), value (B, 1))."""
    batch, state_dim = state.shape
    pad_sd = _round_up(max(state_dim, 1), 8)
    p_rows = packed_params.shape[0]

    tb, n_tiles, padded_b = _pick_tiles(batch, pad_sd)

    x = state
    if padded_b != batch or pad_sd != state_dim:
        x = jnp.pad(state, ((0, padded_b - batch), (0, pad_sd - state_dim)))

    kernel = functools.partial(_ppo_kernel, pad_sd=pad_sd, action_dim=action_dim)
    probs_pad, value_pad = pl.pallas_call(
        kernel,
        out_shape=(
            jax.ShapeDtypeStruct((padded_b, action_dim), jnp.float32),
            jax.ShapeDtypeStruct((padded_b, 1), jnp.float32),
        ),
        grid=(n_tiles,),
        in_specs=[
            pl.BlockSpec((tb, pad_sd), lambda i: (i, 0)),      # state tiles pipeline
            pl.BlockSpec((p_rows, H2), lambda i: (0, 0)),      # weights VMEM-resident
        ],
        out_specs=[
            pl.BlockSpec((tb, action_dim), lambda i: (i, 0)),  # narrow probs output
            pl.BlockSpec((tb, 1), lambda i: (i, 0)),           # narrow value output
        ],
        compiler_params=pltpu.CompilerParams(
            dimension_semantics=("parallel",),
            vmem_limit_bytes=32 * 1024 * 1024),
    )(x, packed_params)

    return probs_pad[:batch], value_pad[:batch]


# ----------------------------------------------------------------------------
# Synthetic params + pure-JAX reference
# ----------------------------------------------------------------------------
def init_params(key, state_dim, action_dim):
    """Deterministic synthetic parameters. Weights stored as (in, out) = W_torch.T."""
    ks = jax.random.split(key, 12)

    def w(k, fan_in, fan_out):
        lim = 1.0 / jnp.sqrt(jnp.float32(fan_in))
        return jax.random.uniform(k, (fan_in, fan_out), jnp.float32, -lim, lim)

    def b(k, fan_in, fan_out):
        lim = 1.0 / jnp.sqrt(jnp.float32(fan_in))
        return jax.random.uniform(k, (1, fan_out), jnp.float32, -lim, lim)

    return {
        # actor
        "aw1": w(ks[0], state_dim, HIDDEN), "ab1": b(ks[1], state_dim, HIDDEN),
        "aw2": w(ks[2], HIDDEN, HIDDEN),    "ab2": b(ks[3], HIDDEN, HIDDEN),
        "aw3": w(ks[4], HIDDEN, action_dim),"ab3": b(ks[5], HIDDEN, action_dim),
        # critic
        "cw1": w(ks[6], state_dim, HIDDEN), "cb1": b(ks[7], state_dim, HIDDEN),
        "cw2": w(ks[8], HIDDEN, HIDDEN),    "cb2": b(ks[9], HIDDEN, HIDDEN),
        "cw3": w(ks[10], HIDDEN, 1),        "cb3": b(ks[11], HIDDEN, 1),
    }


def _reference_forward(state, params):
    h = jnp.tanh(state @ params["aw1"] + params["ab1"])
    h = jnp.tanh(h @ params["aw2"] + params["ab2"])
    probs = jax.nn.softmax(h @ params["aw3"] + params["ab3"], axis=-1)
    hc = jnp.tanh(state @ params["cw1"] + params["cb1"])
    hc = jnp.tanh(hc @ params["cw2"] + params["cb2"])
    value = hc @ params["cw3"] + params["cb3"]
    return probs, value


if __name__ == "__main__":
    batch, state_dim, action_dim = 8, 8, 4

    key = jax.random.PRNGKey(0)
    pkey, skey = jax.random.split(key)
    params = init_params(pkey, state_dim, action_dim)
    packed = pack_params(params, state_dim, action_dim)   # one-time weight fusion
    state = jax.random.normal(skey, (batch, state_dim), jnp.float32)

    probs, value = ppo_actor_critic_forward(state, packed, action_dim)
    jax.block_until_ready((probs, value))

    ref_probs, ref_value = _reference_forward(state, params)
    assert probs.shape == (batch, action_dim) and value.shape == (batch, 1)
    assert jnp.allclose(probs, ref_probs, atol=1e-5, rtol=1e-5)
    assert jnp.allclose(value, ref_value, atol=1e-5, rtol=1e-5)
    assert jnp.allclose(jnp.sum(probs, axis=-1), 1.0, atol=1e-5)

    print("KERNEL_OK")
</pallas_src>

<mosaic_0001>
module attributes {stable_mosaic.version = 11 : i64} {
  func.func @_ppo_kernel(%arg0: i32, %arg1: memref<8x8xf32, #tpu.memory_space<vmem>>, %arg2: memref<288x128xf32, #tpu.memory_space<vmem>>, %arg3: memref<8x4xf32, #tpu.memory_space<vmem>>, %arg4: memref<8x1xf32, #tpu.memory_space<vmem>>) attributes {dimension_semantics = [#tpu.dimension_semantics<parallel>], iteration_bounds = array<i64: 2>, scalar_prefetch = 0 : i64, scratch_operands = 0 : i64, tpu.core_type = #tpu.core_type<tc>, window_params = [{transform_indices = @transform_0, window_bounds = array<i64: 8, 8>}, {pipeline_mode = #tpu.pipeline_mode<synchronous>, transform_indices = @transform_1, window_bounds = array<i64: 288, 128>}, {transform_indices = @transform_2, window_bounds = array<i64: 8, 4>}, {transform_indices = @transform_3, window_bounds = array<i64: 8, 1>}]} {
    %c0 = arith.constant 0 : index
    %c0_0 = arith.constant 0 : index
    %0 = vector.load %arg1[%c0, %c0_0] : memref<8x8xf32, #tpu.memory_space<vmem>>, vector<8x8xf32>
    %c0_1 = arith.constant 0 : index
    %c0_2 = arith.constant 0 : index
    %1 = vector.load %arg2[%c0_1, %c0_2] : memref<288x128xf32, #tpu.memory_space<vmem>>, vector<8x128xf32>
    %c8 = arith.constant 8 : index
    %c0_3 = arith.constant 0 : index
    %2 = vector.load %arg2[%c8, %c0_3] : memref<288x128xf32, #tpu.memory_space<vmem>>, vector<128x128xf32>
    %c136 = arith.constant 136 : index
    %c0_4 = arith.constant 0 : index
    %3 = vector.load %arg2[%c136, %c0_4] : memref<288x128xf32, #tpu.memory_space<vmem>>, vector<128x128xf32>
    %c264 = arith.constant 264 : index
    %c0_5 = arith.constant 0 : index
    %4 = vector.load %arg2[%c264, %c0_5] : memref<288x128xf32, #tpu.memory_space<vmem>>, vector<1x128xf32>
    %c272 = arith.constant 272 : index
    %c0_6 = arith.constant 0 : index
    %5 = vector.load %arg2[%c272, %c0_6] : memref<288x128xf32, #tpu.memory_space<vmem>>, vector<1x128xf32>
    %c280 = arith.constant 280 : index
    %c0_7 = arith.constant 0 : index
    %6 = vector.load %arg2[%c280, %c0_7] : memref<288x128xf32, #tpu.memory_space<vmem>>, vector<1x128xf32>
    %cst = arith.constant dense<0.000000e+00> : vector<8x128xf32>
    %7 = tpu.matmul %0, %1, %cst {dimension_numbers = #tpu.dot_dimension_numbers<[1], [0], [0], [1], [0, 0, 1, 1], [], []>} : vector<8x8xf32>, vector<8x128xf32>, vector<8x128xf32> -> vector<8x128xf32>
    %8 = vector.broadcast %4 : vector<1x128xf32> to vector<8x128xf32>
    %9 = arith.addf %7, %8 : vector<8x128xf32>
    %10 = math.tanh %9 : vector<8x128xf32>
    %cst_8 = arith.constant dense<0.000000e+00> : vector<8x128xf32>
    %11 = tpu.matmul %10, %2, %cst_8 {dimension_numbers = #tpu.dot_dimension_numbers<[1], [0], [0], [1], [0, 0, 1, 1], [], []>} : vector<8x128xf32>, vector<128x128xf32>, vector<8x128xf32> -> vector<8x128xf32>
    %12 = vector.broadcast %5 : vector<1x128xf32> to vector<8x128xf32>
    %13 = arith.addf %11, %12 : vector<8x128xf32>
    %14 = math.tanh %13 : vector<8x128xf32>
    %cst_9 = arith.constant dense<0.000000e+00> : vector<8x128xf32>
    %15 = tpu.matmul %14, %3, %cst_9 {dimension_numbers = #tpu.dot_dimension_numbers<[1], [0], [0], [1], [0, 0, 1, 1], [], []>} : vector<8x128xf32>, vector<128x128xf32>, vector<8x128xf32> -> vector<8x128xf32>
    %16 = vector.broadcast %6 : vector<1x128xf32> to vector<8x128xf32>
    %17 = arith.addf %15, %16 : vector<8x128xf32>
    %18 = tpu.iota {dimensions = array<i32: 1>} : vector<8x128xi32>
    %c4_i32 = arith.constant 4 : i32
    %19 = vector.broadcast %c4_i32 : i32 to vector<8x128xi32>
    %20 = arith.cmpi slt, %18, %19 : vector<8x128xi32>
    %cst_10 = arith.constant 0xFF800000 : f32
    %21 = vector.broadcast %cst_10 : f32 to vector<8x128xf32>
    %22 = arith.select %20, %17, %21 : vector<8x128xi1>, vector<8x128xf32>
    %cst_11 = arith.constant dense<0xFF800000> : vector<8xf32>
    %23 = vector.multi_reduction <maximumf>, %22, %cst_11 [1] : vector<8x128xf32> to vector<8xf32>
    %24 = vector.shape_cast %23 : vector<8xf32> to vector<8x1xf32>
    %25 = vector.broadcast %24 : vector<8x1xf32> to vector<8x128xf32>
    %26 = arith.subf %22, %25 : vector<8x128xf32>
    %27 = math.exp %26 : vector<8x128xf32>
    %cst_12 = arith.constant dense<0.000000e+00> : vector<8xf32>
    %28 = vector.multi_reduction <add>, %27, %cst_12 [1] : vector<8x128xf32> to vector<8xf32>
    %29 = vector.shape_cast %28 : vector<8xf32> to vector<8x1xf32>
    %30 = tpu.reciprocal %29 {approx = true} : vector<8x1xf32> -> vector<8x1xf32>
    %31 = arith.mulf %29, %30 : vector<8x1xf32>
    %cst_13 = arith.constant 2.000000e+00 : f32
    %32 = vector.broadcast %cst_13 : f32 to vector<8x1xf32>
    %33 = arith.subf %32, %31 : vector<8x1xf32>
    %34 = arith.mulf %30, %33 : vector<8x1xf32>
    %35 = vector.broadcast %34 : vector<8x1xf32> to vector<8x128xf32>
    %36 = arith.mulf %27, %35 : vector<8x128xf32>
    %37 = vector.extract_strided_slice %36 {offsets = [0, 0], sizes = [8, 4], strides = [1, 1]} : vector<8x128xf32> to vector<8x4xf32>
    %c0_14 = arith.constant 0 : index
    %c0_15 = arith.constant 0 : index
    %38 = vector.load %arg3[%c0_14, %c0_15] : memref<8x4xf32, #tpu.memory_space<vmem>>, vector<8x4xf32>
    tpu.vector_store %arg3[%c0_14, %c0_15], %37 {strides = array<i32>} : memref<8x4xf32, #tpu.memory_space<vmem>>, vector<8x4xf32>,
    %39 = vector.extract_strided_slice %17 {offsets = [0, 4], sizes = [8, 1], strides = [1, 1]} : vector<8x128xf32> to vector<8x1xf32>
    %c0_16 = arith.constant 0 : index
    %c0_17 = arith.constant 0 : index
    %40 = vector.load %arg4[%c0_16, %c0_17] : memref<8x1xf32, #tpu.memory_space<vmem>>, vector<8x1xf32>
    tpu.vector_store %arg4[%c0_16, %c0_17], %39 {strides = array<i32>} : memref<8x1xf32, #tpu.memory_space<vmem>>, vector<8x1xf32>,
    return
  }
  func.func @transform_0(%arg0: i32) -> (i32, i32) {
    %c0_i32 = arith.constant 0 : i32
    %c0_i32_0 = arith.constant 0 : i32
    return %arg0, %c0_i32 : i32, i32
  }
  func.func @transform_1(%arg0: i32) -> (i32, i32) {
    %c0_i32 = arith.constant 0 : i32
    %c0_i32_0 = arith.constant 0 : i32
    %c0_i32_1 = arith.constant 0 : i32
    return %c0_i32, %c0_i32_0 : i32, i32
  }
  func.func @transform_2(%arg0: i32) -> (i32, i32) {
    %c0_i32 = arith.constant 0 : i32
    %c0_i32_0 = arith.constant 0 : i32
    return %arg0, %c0_i32 : i32, i32
  }
  func.func @transform_3(%arg0: i32) -> (i32, i32) {
    %c0_i32 = arith.constant 0 : i32
    %c0_i32_0 = arith.constant 0 : i32
    return %arg0, %c0_i32 : i32, i32
  }
}

</mosaic_0001>

<bundles_post_ra>
// kernel: ppo_actor_critic_forward.1
= control target key start
LH: loop header
LB: loop body
LE: loop exit
PB: predicated region body
PF: predicated region fallthrough
CT: control target
= control target key end

     0   :  { %9 = vsyncpa [#allocation3], 0  ;;  %s852_s12 = smov 0   ;;  %s935_s0 = inlined_call_operand.vmem [shape: f32[16,8], index: 0, kind: input, shape index: {}]   ;;  %s936_s1 = inlined_call_operand.hbm [shape: f32[288,128], index: 1, kind: input, shape index: {}]   ;;  %s937_s2 = inlined_call_operand.vmem [shape: f32[16,4], index: 2, kind: output, shape index: {0}]   ;;  %s938_s3 = inlined_call_operand.vmem [shape: f32[16,1], index: 3, kind: output, shape index: {1}]  }
   0x1 LB: > { %s858_s13 = sadd.s32 4294967295, %s823_s12   ;;  %p579_p0 = scmp.ge.s32.totalorder %s823_s12, 1  ;;  %s823_s12 = sphi %s852_s12, %s15_s12  }
   0x2   : > { %p119_p1 = scmp.lt.s32.totalorder %s823_s12, 3  ;;  %s825_s14 = smov [#allocation2]  }
   0x3   : > { %s131_s15 = sshll.u32 %s825_s14, 4  ;;  %p939_p3 = scmp.eq.s32.totalorder %s858_s13, 0  ;;  %s132_s15 = int_to_ptr.vmem [resolvable:$true] %s131_s15 }
   0x4   : > { %p862_p2 = pnand %p579_p0, %p119_p1  ;;  %s785_s20 = scalar_lea.hbm %s936_s1, 4608 }
   0x5   : > { %p786_p6 = scmp.ne.s32.totalorder %s936_s1, %s785_s20  ;;  %p792_p10 = scmp.lt.u32.totalorder %s785_s20, %s936_s1 }
   0x6   : > { %s941_s16 = scalar_select %p862_p2, 1, 0 }
   0x7   : > { %p756_p4 = pneg %p862_p2 }
   0x9   : > { %p871_p5 = pnand %p939_p3, %p756_p4 }
   0xb   : > { %p787_p7 = pneg %p871_p5 }
   0xd   : > { %p788_p8 = pnand %p787_p7, %p786_p6 }
   0xf   : > { %p789_p9 = pneg %p788_p8 }
  0x11   : > { %p794_p11 = pnand %p792_p10, %p789_p9 }
  0x13   : > { %797 = shalt.err (!%p794_p11)
}
  0x14   : > { %s798_s25 = scalar_lea.vmem %s132_s15, 4608  ;;  %p806_p1 = scmp.lt.s32.totalorder %s132_s15, %s132_s15 }
  0x15   : > { %p799_p12 = scmp.ne.s32.totalorder %s132_s15, %s798_s25  ;;  %p807_p4 = scmp.lt.s32.totalorder %s798_s25, %s798_s25 }
  0x17   : > { %p801_p13 = pnand %p799_p12, %p787_p7  ;;  %p808_p3 = por %p807_p4, %p806_p1 }
  0x19   : > { %p802_p0 = pneg %p801_p13 }
  0x1b   : > { %p809_p2 = pnand %p808_p3, %p802_p0 }
  0x1d   : > { %812 = shalt.err (!%p809_p2)
}
  0x1e   : > { %s826_s26 = smov 128   ;;  %s827_s27 = smov 8  }
  0x1f   : > { %759 = dma.hbm_to_vmem [thread:$0]  (!%p871_p5), %s936_s1, 4608, %s132_s15, [#allocation3], %s826_s26, %s826_s26, %s827_s27  }
  0x20   : > { %p943_p6 = scmp.ne.s32.totalorder %s941_s16, 0 }
  0x21   : > { %p944_p8 = scmp.eq.s32.totalorder (!%p943_p6), %s858_s13, 0 }
  0x22   : > { %154 = sbr.rel (%p943_p6) target bundleno = 1032 (0x408), region = 28 }
  0x29   : > { %818 = dma.done.wait (%p944_p8), [#allocation3], 4608   ;;  %p945_p7 = pmov %p944_p8 }
  0x2a   : > { %p180_p2 = scmp.lt.s32.totalorder %s858_s13, 1  ;;  %v828_v0 = vmov 0.0   ;;  %vm829_vm0 = vmmov 0   ;;  %v830_v1 = vmov 0.0|0.0   ;;  %vm233_vm1 = vcmask 64512   ;;  %v193_v2 = vld [vmem:[#allocation2] sm:$0xff] }
  0x2b   : > { %820 = vsyncadd (%p945_p7), [#allocation3], 4294962688  ;;  %629 = vmatprep.subr.mxu0 %v828_v0  ;;  %631 = vmatprep.mubr.msk.f32.mxu0 %vm829_vm0, %v828_v0  ;;  %v194_v4 = vld [vmem:[#allocation2 + $0x8] sm:$0xff]  ;;  %v195_v5 = vld [vmem:[#allocation2 + $0x10] sm:$0xff]  ;;  %v457_v62 = vlaneseq  ;;  %s831_s7 = smov 124   ;;  %vm479_vm3 = vcmask 7168  }
  0x2c   : > { %s947_s13 = smov (!%p180_p2, %s858_s13), 1  ;;  %704 = vmatprep.subr.bf16.mxu1 %v830_v1  ;;  %666 = vmatprep.mubr.msk.f32.mxu1 %vm829_vm0, %v828_v0  ;;  %v196_v6 = vld [vmem:[#allocation2 + $0x18] sm:$0xff]  ;;  %v197_v7 = vld [vmem:[#allocation2 + $0x20] sm:$0xff]  ;;  %v705_v8 = vpack.c.bf16 %v195_v5, %v194_v4  ;;  %v198_v10 = vld [vmem:[#allocation2 + $0x28] sm:$0xff]  ;;  %vm473_vm4 = vcmask 31744  }
  0x2d   : > { %s902_s30 = sshll.u32 %s947_s13, 3  ;;  %630 = vmatpush3.msra.mxu0 %v193_v2  ;;  %v708_v9 = vpack.c.bf16 %v197_v7, %v196_v6  ;;  %v199_v11 = vld [vmem:[#allocation2 + $0x30] sm:$0xff]  ;;  %v200_v13 = vld [vmem:[#allocation2 + $0x38] sm:$0xff]  ;;  %v201_v14 = vld [vmem:[#allocation2 + $0x40] sm:$0xff]  ;;  %v458_v63 = vand.u32 127, %v457_v62 }
  0x2e   : > { %s183_s6 = scalar_lea.vmem %s935_s0, %s902_s30  ;;  %728 = vmatprep.subr.bf16.mxu0 %v830_v1  ;;  %706 = vmatpush3.bf16.msra.mxu1 %v705_v8  ;;  %v711_v12 = vpack.c.bf16 %v199_v11, %v198_v10  ;;  %v714_v15 = vpack.c.bf16 %v201_v14, %v200_v13  ;;  %v202_v16 = vld [vmem:[#allocation2 + $0x48] sm:$0xff]  ;;  %v203_v17 = vld [vmem:[#allocation2 + $0x50] sm:$0xff]  ;;  %v204_v19 = vld [vmem:[#allocation2 + $0x58] sm:$0xff]  ;;  %s191_s10 = scalar_lea.vmem %s938_s3, %s902_s30 }
  0x2f   : > { %v192_v3 = vld [vmem:[%s183_s6] sm:$0xff]  ;;  %707 = vmatprep.subr.bf16.mxu1 %v830_v1  ;;  %v717_v18 = vpack.c.bf16 %v203_v17, %v202_v16  ;;  %v206_v22 = vld [vmem:[#allocation2 + $0x68] sm:$0xff]  ;;  %v207_v23 = vld [vmem:[#allocation2 + $0x70] sm:$0xff]  ;;  %vm459_vm2 = vcmp.lt.s32.totalorder %v458_v63, 4  ;;  %s187_s14 = scalar_lea.vmem %s937_s2, %s902_s30 }
  0x30   : > { %632 = vmatmul.mubr.msk.f32.vlgmr.msra.gmra.mrb[0].mxu0 %vm233_vm1, %v192_v3  ;;  %v205_v20 = vld [vmem:[#allocation2 + $0x60] sm:$0xff]  ;;  %v723_v24 = vpack.c.bf16 %v207_v23, %v206_v22  ;;  %v208_v25 = vld [vmem:[#allocation2 + $0x78] sm:$0xff]  ;;  %v210_v28 = vld [vmem:[#allocation2 + $0x88] sm:$0xff] }
  0x31   : > { %701 = vmatprep.mubr.msk.f32.mxu0 %vm829_vm0, %v828_v0  ;;  %v720_v21 = vpack.c.bf16 %v205_v20, %v204_v19  ;;  %v209_v26 = vld [vmem:[#allocation2 + $0x80] sm:$0xff]  ;;  %v211_v29 = vld [vmem:[#allocation2 + $0x90] sm:$0xff]  ;;  %v212_v30 = vld [vmem:[#allocation2 + $0x98] sm:$0xff] }
  0x32   : > { %709 = vmatpush3.bf16.msra.mxu1 %v708_v9  ;;  %v726_v27 = vpack.c.bf16 %v209_v26, %v208_v25  ;;  %v729_v31 = vpack.c.bf16 %v211_v29, %v210_v28  ;;  %v213_v32 = vld [vmem:[#allocation2 + $0xa0] sm:$0xff]  ;;  %v214_v34 = vld [vmem:[#allocation2 + $0xa8] sm:$0xff]  ;;  %v215_v35 = vld [vmem:[#allocation2 + $0xb0] sm:$0xff] }
  0x33   : > { %710 = vmatprep.subr.bf16.mxu1 %v830_v1  ;;  %v732_v33 = vpack.c.bf16 %v213_v32, %v212_v30  ;;  %v735_v36 = vpack.c.bf16 %v215_v35, %v214_v34  ;;  %v216_v37 = vld [vmem:[#allocation2 + $0xb8] sm:$0xff]  ;;  %v217_v38 = vld [vmem:[#allocation2 + $0xc0] sm:$0xff]  ;;  %v218_v40 = vld [vmem:[#allocation2 + $0xc8] sm:$0xff] }
  0x34   : > { %730 = vmatpush3.bf16.msra.mxu0 %v729_v31  ;;  %v738_v39 = vpack.c.bf16 %v217_v38, %v216_v37  ;;  %v219_v41 = vld [vmem:[#allocation2 + $0xd0] sm:$0xff]  ;;  %v587_v43 = vld [vmem:[#allocation2 + $0x108] ss:$0 sm:$0xff]  ;;  %v220_v48 = vld [vmem:[#allocation2 + $0xd8] sm:$0xff] }
  0x35   : > { %731 = vmatprep.subr.bf16.mxu0 %v830_v1  ;;  %v741_v42 = vpack.c.bf16 %v219_v41, %v218_v40  ;;  %v221_v49 = vld [vmem:[#allocation2 + $0xe0] sm:$0xff]  ;;  %v222_v51 = vld [vmem:[#allocation2 + $0xe8] sm:$0xff]  ;;  %v223_v52 = vld [vmem:[#allocation2 + $0xf0] sm:$0xff] }
  0x36   : > { %712 = vmatpush3.bf16.msra.mxu1 %v711_v12  ;;  %v744_v50 = vpack.c.bf16 %v221_v49, %v220_v48  ;;  %v747_v53 = vpack.c.bf16 %v223_v52, %v222_v51  ;;  %v224_v54 = vld [vmem:[#allocation2 + $0xf8] sm:$0xff]  ;;  %v225_v55 = vld [vmem:[#allocation2 + $0x100] sm:$0xff]  ;;  %v589_v57 = vld [vmem:[#allocation2 + $0x110] ss:$0 sm:$0xff] }
  0x37   : > { %713 = vmatprep.subr.bf16.mxu1 %v830_v1  ;;  %v750_v56 = vpack.c.bf16 %v225_v55, %v224_v54  ;;  %v590_v0 = vld [vmem:[#allocation2 + $0x118] ss:$0 sm:$0xff] }
  0x38   : > { %733 = vmatpush3.bf16.msra.mxu0 %v732_v33 }
  0x39   : > { %734 = vmatprep.subr.bf16.mxu0 %v830_v1 }
  0x3a   : > { %715 = vmatpush3.bf16.msra.mxu1 %v714_v15 }
  0x3b   : > { %716 = vmatprep.subr.bf16.mxu1 %v830_v1 }
  0x3c   : > { %736 = vmatpush3.bf16.msra.mxu0 %v735_v36 }
  0x3d   : > { %737 = vmatprep.subr.bf16.mxu0 %v830_v1 }
  0x3e   : > { %718 = vmatpush3.bf16.msra.mxu1 %v717_v18 }
  0x3f   : > { %719 = vmatprep.subr.bf16.mxu1 %v830_v1 }
  0x40   : > { %739 = vmatpush3.bf16.msra.mxu0 %v738_v39 }
  0x41   : > { %740 = vmatprep.subr.bf16.mxu0 %v830_v1 }
  0x42   : > { %721 = vmatpush3.bf16.msra.mxu1 %v720_v21 }
  0x43   : > { %722 = vmatprep.subr.bf16.mxu1 %v830_v1 }
  0x44   : > { %742 = vmatpush3.bf16.msra.mxu0 %v741_v42 }
  0x45   : > { %743 = vmatprep.subr.bf16.mxu0 %v830_v1 }
  0x46   : > { %724 = vmatpush3.bf16.msra.mxu1 %v723_v24 }
  0x47   : > { %725 = vmatprep.subr.bf16.mxu1 %v830_v1 }
  0x48   : > { %745 = vmatpush3.bf16.msra.mxu0 %v744_v50 }
  0x49   : > { %746 = vmatprep.subr.bf16.mxu0 %v830_v1 }
  0x4a   : > { %727 = vmatpush3.bf16.msra.mxu1 %v726_v27 }
  0x4c   : > { %748 = vmatpush3.bf16.msra.mxu0 %v747_v53 }
  0x4d   : > { %749 = vmatprep.subr.bf16.mxu0 %v830_v1 }
  0x50   : > { %751 = vmatpush3.bf16.msra.mxu0 %v750_v56 }
 0x103   : > { %v303_v44 = vpop.f32.mrb[0].mxu0 }
 0x104   : > { %v304_v45 = vadd.f32 %v587_v43, %v303_v44  ;;  %v633_v46 = vpop.f32.mrb[1].mxu0 }
 0x106   : > { %777 = vtanh.f32 %v304_v45 }
 0x110   : > { %v778_v47 = vpop.eup %777 }
 0x111   : > { %667 = vmatmul.mubr.f32.vlgmr.msra.gmra.mrb[0].mxu1 %v778_v47 }
 0x1e4   : > { %v378_v58 = vpop.f32.mrb[0].mxu1 }
 0x1e5   : > { %v379_v59 = vadd.f32 %v589_v57, %v378_v58  ;;  %v668_v60 = vpop.f32.mrb[1].mxu1 }
 0x1e7   : > { %779 = vtanh.f32 %v379_v59 }
 0x1f1   : > { %v780_v61 = vpop.eup %779 }
 0x1f2   : > { %702 = vmatmul.mubr.f32.vlgmr.msra.gmra.mrb[2].mxu0 %v780_v61 }
 0x2c5   : > { %v453_v2 = vpop.f32.mrb[2].mxu0 }
 0x2c6   : > { %v454_v3 = vadd.f32 %v590_v0, %v453_v2  ;;  %v703_v4 = vpop.f32.mrb[3].mxu0 }
 0x2c8   : > { %476 = vrot.lane.b32.xlu1 %v454_v3, %s831_s7  ;;  %v460_v5 = vsel %vm459_vm2, %v454_v3, -inf }
 0x2c9   : > { %461 = vmax.xlane.f32.xlu0 %v460_v5 }
 0x33a   : > { %v477_v1 = vpop.permute.xlu1 %476 }
 0x33b   : > { %480 = vst.msk [vmem:[%s191_s10] sm:$0xff] %vm479_vm3, %v477_v1 }
 0x356   : > { %v462_v6 = vpop.xlane.xlu0 %461 }
 0x357   : > { %v463_v7 = vsub.f32 %v460_v5, %v462_v6 }
 0x359   : > { %v464_v8 = vmul.f32 1.442695, %v463_v7 }
 0x35b   : > { %781 = vpow2.f32 %v464_v8 }
 0x365   : > { %v782_v9 = vpop.eup %781 }
 0x366   : > { %466 = vadd.xlane.f32.xlu0 %v782_v9 }
 0x3f3   : > { %v467_v10 = vpop.xlane.xlu0 %466 }
 0x3f4   : > { %783 = vrcp.f32 %v467_v10 }
 0x3fe   : > { %v784_v11 = vpop.eup %783 }
 0x3ff   : > { %v469_v12 = vmul.f32 %v784_v11, %v467_v10 }
 0x401   : > { %v470_v13 = vsub.f32 2.0, %v469_v12 }
 0x403   : > { %v471_v14 = vmul.f32 %v784_v11, %v470_v13 }
 0x405   : > { %v472_v15 = vmul.f32 %v782_v9, %v471_v14 }
 0x407   : > { %474 = vst.msk [vmem:[%s187_s14] sm:$0xff] %vm473_vm4, %v472_v15 }
 0x408 PF: > { %s15_s12 = sadd.s32 1, %s823_s12  }
 0x409   : > { %p12_p3 = scmp.ge.s32.totalorder %s15_s12, 4  }
 0x40b   :  { %14 = sbr.rel (!%p12_p3) target bundleno = 1 (0x1), region = 75 }
 0x412   :  { %514 = vsyncpa [#allocation3], 1 }
 0x413   :  { %516 = vsyncpa [#allocation3 + $0x1], 1 }

</bundles_post_ra>
